<compile_context>
chip_gen: v5e
topology: v5e:2x2
jax: 0.10.0
libtpu: 0.0.40
codegen_flags: <defaults>
</compile_context>

<pallas_src>
import jax
import jax.numpy as jnp
from jax.experimental import pallas as pl
from jax.experimental.pallas import tpu as pltpu


def _round_up(x, m):
    return ((x + m - 1) // m) * m


def dam_forward_kernel(x_ref, w1_ref, b1_ref, w2_ref, b2_ref, wpt_ref, bp_ref,
                       o_ref):
    # hidden1 = relu(x @ W1 + b1); MXU dot in the streaming dtype, f32 acc,
    # bias + ReLU kept in f32 (v5e has no bf16 VPU path).
    h1 = jnp.dot(x_ref[...], w1_ref[...], preferred_element_type=jnp.float32)
    h1 = jnp.maximum(h1 + b1_ref[...], 0.0)
    # hidden2 = relu(h1 @ W2 + b2)
    h2 = jnp.dot(h1.astype(w2_ref.dtype), w2_ref[...],
                 preferred_element_type=jnp.float32)
    h2 = jnp.maximum(h2 + b2_ref[...], 0.0)
    # Both heads at once, transposed so batch maps to lanes (lane-dense store):
    #   p_t[r, b] = sum_k Wp^T[r, k] * h2[b, k]    -> (2, tm)
    p_t = jax.lax.dot_general(
        wpt_ref[...], h2,
        dimension_numbers=(((1,), (1,)), ((), ())),
        preferred_element_type=jnp.float32)
    o_ref[...] = jnp.maximum(p_t + bp_ref[...], 0.0).astype(o_ref.dtype)


def dam_forward_fused(x, params, *, tm=512, compute_dtype=jnp.float32):
    """Fused MLP forward for BOTH heads.

    x: (B, 2E) f32. Returns (pred_i, pred_b), each (B, 1) f32.
    """
    B, H = x.shape  # H = 2 * emb_dim

    w1 = params["w1"].astype(compute_dtype)
    w2 = params["w2"].astype(compute_dtype)
    b1, b2 = params["b1"], params["b2"]                       # (1, H) f32
    # Fuse the two (H, 1) heads into one (2, H) pre-transposed projection.
    wpt = jnp.concatenate([params["wp_i"], params["wp_b"]], axis=1).T  # (2, H)
    bp = jnp.concatenate([params["bp_i"], params["bp_b"]], axis=1).T   # (2, 1)
    wpt = wpt.astype(jnp.float32)
    bp = bp.astype(jnp.float32)

    # tm must be a multiple of 128 so the transposed output (2, tm) is
    # lane-dense; also a multiple of 16 for bf16 sublane packing of x.
    if B >= 2 * 128:
        # keep at least 2 "parallel" grid steps when possible (v7x has 2 TCs).
        tm = min(tm, _round_up(pl.cdiv(B, 2), 128))
    tm = max(128, min(tm, _round_up(B, 128)))

    b_pad = _round_up(B, tm)
    if b_pad != B:
        x = jnp.pad(x, ((0, b_pad - B), (0, 0)))
    x = x.astype(compute_dtype)
    grid = (b_pad // tm,)

    itemsize = jnp.dtype(compute_dtype).itemsize
    cost = pl.CostEstimate(
        flops=2 * b_pad * (2 * H * H + 2 * H),
        transcendentals=0,
        bytes_accessed=(b_pad * H + w1.size + w2.size) * itemsize
        + (b1.size + b2.size + wpt.size + bp.size + 2 * b_pad) * 4,
    )

    full = lambda shape: pl.BlockSpec(shape, lambda i: tuple(0 for _ in shape))

    out_t = pl.pallas_call(
        dam_forward_kernel,
        out_shape=jax.ShapeDtypeStruct((2, b_pad), jnp.float32),
        grid_spec=pltpu.PrefetchScalarGridSpec(
            num_scalar_prefetch=0,
            grid=grid,
            in_specs=[
                pl.BlockSpec((tm, H), lambda i: (i, 0)),   # x: tiled over batch
                full(w1.shape),                            # W1  (H, H)
                full(b1.shape),                            # b1  (1, H)
                full(w2.shape),                            # W2  (H, H)
                full(b2.shape),                            # b2  (1, H)
                full(wpt.shape),                           # Wp^T (2, H)
                full(bp.shape),                            # bp  (2, 1)
            ],
            # lane-dense output: batch on the 128-lane axis.
            out_specs=pl.BlockSpec((2, tm), lambda i: (0, i)),
        ),
        compiler_params=pltpu.CompilerParams(
            dimension_semantics=("parallel",)),
        cost_estimate=cost,
    )(x, w1, b1, w2, b2, wpt, bp)

    out_t = out_t[:, :B]                       # drop batch padding
    return out_t[0][:, None], out_t[1][:, None]


def dam_forward(x, params, *, bundle=False, tm=512, compute_dtype=jnp.float32):
    """Module-equivalent forward: returns (B, 1) for the selected head."""
    out_i, out_b = dam_forward_fused(x, params, tm=tm,
                                     compute_dtype=compute_dtype)
    return out_b if bundle else out_i


def xavier_normal(key, shape):
    fan_in, fan_out = shape[0], shape[1]
    std = (2.0 / (fan_in + fan_out)) ** 0.5
    return std * jax.random.normal(key, shape, dtype=jnp.float32)


def init_dam_params(key, emb_dim):
    """Deterministic init of the forward-path Linear layers (shapes from
    Dam.__init__). Weights are stored pre-transposed as (in, out)."""
    H = 2 * emb_dim
    keys = jax.random.split(key, 8)
    return {
        "w1": xavier_normal(keys[0], (H, H)),
        "b1": jnp.zeros((1, H), jnp.float32),
        "w2": xavier_normal(keys[1], (H, H)),
        "b2": jnp.zeros((1, H), jnp.float32),
        "wp_i": xavier_normal(keys[2], (H, 1)),
        "bp_i": jnp.zeros((1, 1), jnp.float32),
        "wp_b": xavier_normal(keys[3], (H, 1)),
        "bp_b": jnp.zeros((1, 1), jnp.float32),
    }


def dam_forward_ref(x, params, *, bundle=False):
    """Pure-JAX reference for correctness checking."""
    h = jnp.maximum(x @ params["w1"] + params["b1"], 0.0)
    h = jnp.maximum(h @ params["w2"] + params["b2"], 0.0)
    if bundle:
        wp, bp = params["wp_b"], params["bp_b"]
    else:
        wp, bp = params["wp_i"], params["bp_i"]
    return jnp.maximum(h @ wp + bp, 0.0)


if __name__ == "__main__":
    emb_dim = 32          # embedding dim -> forward input width is 2*emb_dim
    H = 2 * emb_dim

    key = jax.random.PRNGKey(0)
    k_param, k_x1, k_x2 = jax.random.split(key, 3)
    params = init_dam_params(k_param, emb_dim)

    # ---- small batch (module-like usage), f32 path, both heads in one call --
    batch = 16
    x = jax.random.normal(k_x1, (batch, H), dtype=jnp.float32)
    out_i, out_b = dam_forward_fused(x, params)
    out_i, out_b = jax.block_until_ready((out_i, out_b))
    ref_i = dam_forward_ref(x, params, bundle=False)
    ref_b = dam_forward_ref(x, params, bundle=True)
    assert out_i.shape == (batch, 1) and out_b.shape == (batch, 1)
    assert jnp.allclose(out_i, ref_i, atol=1e-5, rtol=1e-5)
    assert jnp.allclose(out_b, ref_b, atol=1e-5, rtol=1e-5)

    # ---- non-tile-divisible batch: exercises padding + multi-step grid ------
    batch2 = 300
    x2 = jax.random.normal(k_x2, (batch2, H), dtype=jnp.float32)
    out2_i, out2_b = dam_forward_fused(x2, params)
    out2_i, out2_b = jax.block_until_ready((out2_i, out2_b))
    assert jnp.allclose(out2_i, dam_forward_ref(x2, params, bundle=False),
                        atol=1e-5, rtol=1e-5)
    assert jnp.allclose(out2_b, dam_forward_ref(x2, params, bundle=True),
                        atol=1e-5, rtol=1e-5)

    # ---- bf16 streaming path (memory-bound win); f32 accumulate ------------
    out3_i, out3_b = dam_forward_fused(x2, params, compute_dtype=jnp.bfloat16)
    out3_i, out3_b = jax.block_until_ready((out3_i, out3_b))
    assert jnp.allclose(out3_i, dam_forward_ref(x2, params, bundle=False),
                        atol=1e-1, rtol=1e-1)
    assert jnp.allclose(out3_b, dam_forward_ref(x2, params, bundle=True),
                        atol=1e-1, rtol=1e-1)

    # module-equivalent single-head convenience call
    sel = dam_forward(x, params, bundle=True)
    sel = jax.block_until_ready(sel)
    assert jnp.allclose(sel, ref_b, atol=1e-5, rtol=1e-5)

    print("KERNEL_OK")
</pallas_src>

<mosaic_0001>
module attributes {stable_mosaic.version = 11 : i64} {
  func.func @dam_forward_kernel(%arg0: i32, %arg1: memref<128x64xf32, #tpu.memory_space<vmem>>, %arg2: memref<64x64xf32, #tpu.memory_space<vmem>>, %arg3: memref<1x64xf32, #tpu.memory_space<vmem>>, %arg4: memref<64x64xf32, #tpu.memory_space<vmem>>, %arg5: memref<1x64xf32, #tpu.memory_space<vmem>>, %arg6: memref<2x64xf32, #tpu.memory_space<vmem>>, %arg7: memref<2x1xf32, #tpu.memory_space<vmem>>, %arg8: memref<2x128xf32, #tpu.memory_space<vmem>>) attributes {dimension_semantics = [#tpu.dimension_semantics<parallel>], iteration_bounds = array<i64: 1>, scalar_prefetch = 0 : i64, scratch_operands = 0 : i64, tpu.core_type = #tpu.core_type<tc>, window_params = [{transform_indices = @transform_0, window_bounds = array<i64: 128, 64>}, {pipeline_mode = #tpu.pipeline_mode<synchronous>, transform_indices = @transform_1, window_bounds = array<i64: 64, 64>}, {pipeline_mode = #tpu.pipeline_mode<synchronous>, transform_indices = @transform_2, window_bounds = array<i64: 1, 64>}, {pipeline_mode = #tpu.pipeline_mode<synchronous>, transform_indices = @transform_3, window_bounds = array<i64: 64, 64>}, {pipeline_mode = #tpu.pipeline_mode<synchronous>, transform_indices = @transform_4, window_bounds = array<i64: 1, 64>}, {pipeline_mode = #tpu.pipeline_mode<synchronous>, transform_indices = @transform_5, window_bounds = array<i64: 2, 64>}, {pipeline_mode = #tpu.pipeline_mode<synchronous>, transform_indices = @transform_6, window_bounds = array<i64: 2, 1>}, {transform_indices = @transform_7, window_bounds = array<i64: 2, 128>}]} {
    %c0 = arith.constant 0 : index
    %c0_0 = arith.constant 0 : index
    %0 = vector.load %arg1[%c0, %c0_0] : memref<128x64xf32, #tpu.memory_space<vmem>>, vector<128x64xf32>
    %c0_1 = arith.constant 0 : index
    %c0_2 = arith.constant 0 : index
    %1 = vector.load %arg2[%c0_1, %c0_2] : memref<64x64xf32, #tpu.memory_space<vmem>>, vector<64x64xf32>
    %cst = arith.constant dense<0.000000e+00> : vector<128x64xf32>
    %2 = tpu.matmul %0, %1, %cst {dimension_numbers = #tpu.dot_dimension_numbers<[1], [0], [0], [1], [0, 0, 1, 1], [], []>} : vector<128x64xf32>, vector<64x64xf32>, vector<128x64xf32> -> vector<128x64xf32>
    %c0_3 = arith.constant 0 : index
    %c0_4 = arith.constant 0 : index
    %3 = vector.load %arg3[%c0_3, %c0_4] : memref<1x64xf32, #tpu.memory_space<vmem>>, vector<1x64xf32>
    %4 = vector.broadcast %3 : vector<1x64xf32> to vector<128x64xf32>
    %5 = arith.addf %2, %4 : vector<128x64xf32>
    %cst_5 = arith.constant 0.000000e+00 : f32
    %6 = vector.broadcast %cst_5 : f32 to vector<128x64xf32>
    %7 = arith.maximumf %5, %6 : vector<128x64xf32>
    %c0_6 = arith.constant 0 : index
    %c0_7 = arith.constant 0 : index
    %8 = vector.load %arg4[%c0_6, %c0_7] : memref<64x64xf32, #tpu.memory_space<vmem>>, vector<64x64xf32>
    %cst_8 = arith.constant dense<0.000000e+00> : vector<128x64xf32>
    %9 = tpu.matmul %7, %8, %cst_8 {dimension_numbers = #tpu.dot_dimension_numbers<[1], [0], [0], [1], [0, 0, 1, 1], [], []>} : vector<128x64xf32>, vector<64x64xf32>, vector<128x64xf32> -> vector<128x64xf32>
    %c0_9 = arith.constant 0 : index
    %c0_10 = arith.constant 0 : index
    %10 = vector.load %arg5[%c0_9, %c0_10] : memref<1x64xf32, #tpu.memory_space<vmem>>, vector<1x64xf32>
    %11 = vector.broadcast %10 : vector<1x64xf32> to vector<128x64xf32>
    %12 = arith.addf %9, %11 : vector<128x64xf32>
    %cst_11 = arith.constant 0.000000e+00 : f32
    %13 = vector.broadcast %cst_11 : f32 to vector<128x64xf32>
    %14 = arith.maximumf %12, %13 : vector<128x64xf32>
    %c0_12 = arith.constant 0 : index
    %c0_13 = arith.constant 0 : index
    %15 = vector.load %arg6[%c0_12, %c0_13] : memref<2x64xf32, #tpu.memory_space<vmem>>, vector<2x64xf32>
    %cst_14 = arith.constant dense<0.000000e+00> : vector<2x128xf32>
    %16 = tpu.matmul %15, %14, %cst_14 {dimension_numbers = #tpu.dot_dimension_numbers<[1], [1], [0], [0], [0, 0, 1, 0], [], []>} : vector<2x64xf32>, vector<128x64xf32>, vector<2x128xf32> -> vector<2x128xf32>
    %c0_15 = arith.constant 0 : index
    %c0_16 = arith.constant 0 : index
    %17 = vector.load %arg7[%c0_15, %c0_16] : memref<2x1xf32, #tpu.memory_space<vmem>>, vector<2x1xf32>
    %18 = vector.broadcast %17 : vector<2x1xf32> to vector<2x128xf32>
    %19 = arith.addf %16, %18 : vector<2x128xf32>
    %cst_17 = arith.constant 0.000000e+00 : f32
    %20 = vector.broadcast %cst_17 : f32 to vector<2x128xf32>
    %21 = arith.maximumf %19, %20 : vector<2x128xf32>
    %c0_18 = arith.constant 0 : index
    %c0_19 = arith.constant 0 : index
    %22 = vector.load %arg8[%c0_18, %c0_19] : memref<2x128xf32, #tpu.memory_space<vmem>>, vector<2x128xf32>
    tpu.vector_store %arg8[%c0_18, %c0_19], %21 {strides = array<i32>} : memref<2x128xf32, #tpu.memory_space<vmem>>, vector<2x128xf32>,
    return
  }
  func.func @transform_0(%arg0: i32) -> (i32, i32) {
    %c0_i32 = arith.constant 0 : i32
    %c0_i32_0 = arith.constant 0 : i32
    return %arg0, %c0_i32 : i32, i32
  }
  func.func @transform_1(%arg0: i32) -> (i32, i32) {
    %c0_i32 = arith.constant 0 : i32
    %c0_i32_0 = arith.constant 0 : i32
    %c0_i32_1 = arith.constant 0 : i32
    return %c0_i32, %c0_i32_0 : i32, i32
  }
  func.func @transform_2(%arg0: i32) -> (i32, i32) {
    %c0_i32 = arith.constant 0 : i32
    %c0_i32_0 = arith.constant 0 : i32
    %c0_i32_1 = arith.constant 0 : i32
    return %c0_i32, %c0_i32_0 : i32, i32
  }
  func.func @transform_3(%arg0: i32) -> (i32, i32) {
    %c0_i32 = arith.constant 0 : i32
    %c0_i32_0 = arith.constant 0 : i32
    %c0_i32_1 = arith.constant 0 : i32
    return %c0_i32, %c0_i32_0 : i32, i32
  }
  func.func @transform_4(%arg0: i32) -> (i32, i32) {
    %c0_i32 = arith.constant 0 : i32
    %c0_i32_0 = arith.constant 0 : i32
    %c0_i32_1 = arith.constant 0 : i32
    return %c0_i32, %c0_i32_0 : i32, i32
  }
  func.func @transform_5(%arg0: i32) -> (i32, i32) {
    %c0_i32 = arith.constant 0 : i32
    %c0_i32_0 = arith.constant 0 : i32
    %c0_i32_1 = arith.constant 0 : i32
    return %c0_i32, %c0_i32_0 : i32, i32
  }
  func.func @transform_6(%arg0: i32) -> (i32, i32) {
    %c0_i32 = arith.constant 0 : i32
    %c0_i32_0 = arith.constant 0 : i32
    %c0_i32_1 = arith.constant 0 : i32
    return %c0_i32, %c0_i32_0 : i32, i32
  }
  func.func @transform_7(%arg0: i32) -> (i32, i32) {
    %c0_i32 = arith.constant 0 : i32
    %c0_i32_0 = arith.constant 0 : i32
    return %c0_i32, %arg0 : i32, i32
  }
}

</mosaic_0001>

<bundles_post_ra>
// kernel: tpu_custom_call.1
= control target key start
LH: loop header
LB: loop body
LE: loop exit
PB: predicated region body
PF: predicated region fallthrough
CT: control target
= control target key end

     0   :  { %s723_s0 = inlined_call_operand.vmem [shape: f32[128,64], index: 0, kind: input, shape index: {}]   ;;  %s724_s1 = inlined_call_operand.vmem [shape: f32[64,64], index: 1, kind: input, shape index: {}]   ;;  %s725_s2 = inlined_call_operand.vmem [shape: f32[1,64], index: 2, kind: input, shape index: {}]   ;;  %s726_s3 = inlined_call_operand.vmem [shape: f32[64,64], index: 3, kind: input, shape index: {}]   ;;  %s727_s4 = inlined_call_operand.vmem [shape: f32[1,64], index: 4, kind: input, shape index: {}]   ;;  %s728_s5 = inlined_call_operand.vmem [shape: f32[2,64], index: 5, kind: input, shape index: {}]   ;;  %s729_s6 = inlined_call_operand.vmem [shape: f32[2,1], index: 6, kind: input, shape index: {}]   ;;  %s730_s7 = inlined_call_operand.hbm [shape: f32[2,128], index: 7, kind: output, shape index: {}]  }
   0x1   :  { %v50_v0 = vld [vmem:[%s724_s1 + $0x38] sm:$0xff]  ;;  %v49_v1 = vld [vmem:[%s724_s1 + $0x30] sm:$0xff]  ;;  %v48_v2 = vld [vmem:[%s724_s1 + $0x28] sm:$0xff] }
   0x2   :  { %471 = vmatpush.msra.mxu2 %v50_v0  ;;  %112 = vmatpush.msra.mxu0 %v50_v0  ;;  %v47_v3 = vld [vmem:[%s724_s1 + $0x20] sm:$0xff] }
   0x4   :  { %472 = vmatpush.msra.mxu2 %v49_v1  ;;  %113 = vmatpush.msra.mxu0 %v49_v1 }
   0x6   :  { %473 = vmatpush.msra.mxu2 %v48_v2  ;;  %114 = vmatpush.msra.mxu0 %v48_v2 }
   0x7   :  { %12 = vsyncpa [#allocation3], 0  ;;  %v46_v4 = vld [vmem:[%s724_s1 + $0x18] sm:$0xff]  ;;  %v45_v5 = vld [vmem:[%s724_s1 + $0x10] sm:$0xff]  ;;  %vm55_vm0 = vcmask 523264   ;;  %s519_s20 = smov [#allocation2]  }
   0x8   :  { %474 = vmatpush.msra.mxu2 %v47_v3  ;;  %115 = vmatpush.msra.mxu0 %v47_v3  ;;  %v44_v6 = vld [vmem:[%s724_s1 + $0x8] sm:$0xff]  ;;  %v43_v7 = vld [vmem:[%s724_s1] sm:$0xff]  ;;  %v37_v8 = vld [vmem:[%s723_s0 + $0x50] sm:$0xff]  ;;  %s411_s21 = sshll.u32 %s519_s20, 4  ;;  %s413_s23 = sshll.u32 %s730_s7, 4  ;;  %s412_s21 = int_to_ptr.vmem [resolvable:$true] %s411_s21  ;;  %s414_s23 = int_to_ptr.hbm [resolvable:$true] %s413_s23 }
   0x9   :  { %v27_v9 = vld [vmem:[%s723_s0] sm:$0xff]  ;;  %v38_v10 = vld [vmem:[%s723_s0 + $0x58] sm:$0xff]  ;;  %v28_v11 = vld [vmem:[%s723_s0 + $0x8] sm:$0xff] }
   0xa   :  { %475 = vmatpush.msra.mxu2 %v46_v4  ;;  %116 = vmatpush.msra.mxu0 %v46_v4  ;;  %v39_v12 = vld [vmem:[%s723_s0 + $0x60] sm:$0xff]  ;;  %v29_v13 = vld [vmem:[%s723_s0 + $0x10] sm:$0xff]  ;;  %v40_v14 = vld [vmem:[%s723_s0 + $0x68] sm:$0xff] }
   0xb   :  { %v30_v15 = vld [vmem:[%s723_s0 + $0x18] sm:$0xff]  ;;  %v41_v16 = vld [vmem:[%s723_s0 + $0x70] sm:$0xff]  ;;  %v31_v17 = vld [vmem:[%s723_s0 + $0x20] sm:$0xff] }
   0xc   :  { %476 = vmatpush.msra.mxu2 %v45_v5  ;;  %117 = vmatpush.msra.mxu0 %v45_v5  ;;  %v42_v18 = vld [vmem:[%s723_s0 + $0x78] sm:$0xff]  ;;  %v32_v19 = vld [vmem:[%s723_s0 + $0x28] sm:$0xff]  ;;  %v191_v21 = vld [vmem:[%s726_s3 + $0x30] sm:$0xff] }
   0xd   :  { %v192_v20 = vld [vmem:[%s726_s3 + $0x38] sm:$0xff]  ;;  %v190_v22 = vld [vmem:[%s726_s3 + $0x28] sm:$0xff]  ;;  %v189_v23 = vld [vmem:[%s726_s3 + $0x20] sm:$0xff] }
   0xe   :  { %477 = vmatpush.msra.mxu2 %v44_v6  ;;  %118 = vmatpush.msra.mxu0 %v44_v6  ;;  %v33_v24 = vld [vmem:[%s723_s0 + $0x30] sm:$0xff]  ;;  %v188_v25 = vld [vmem:[%s726_s3 + $0x18] sm:$0xff]  ;;  %v35_v27 = vld [vmem:[%s723_s0 + $0x40] sm:$0xff] }
   0xf   :  { %253 = vmatpush.msra.mxu1 %v192_v20  ;;  %479 = vmatpush.msra.mxu3 %v192_v20  ;;  %v34_v26 = vld [vmem:[%s723_s0 + $0x38] sm:$0xff]  ;;  %v36_v28 = vld [vmem:[%s723_s0 + $0x48] sm:$0xff]  ;;  %v187_v29 = vld [vmem:[%s726_s3 + $0x10] sm:$0xff] }
  0x10   :  { %478 = vmatpush.msra.mxu2 %v43_v7  ;;  %119 = vmatpush.msra.mxu0 %v43_v7  ;;  %v186_v30 = vld [vmem:[%s726_s3 + $0x8] sm:$0xff]  ;;  %v185_v31 = vld [vmem:[%s726_s3] sm:$0xff] }
  0x11   :  { %432 = vmatmul.msk.f32.vlgmr.msra.gmra.mxu2 %vm55_vm0, %v37_v8  ;;  %422 = vmatmul.msk.f32.vlgmr.msra.gmra.mxu0 %vm55_vm0, %v27_v9  ;;  %v490_v32 = vld [vmem:[%s725_s2] ss:$0 sm:$0xff] }
  0x12   :  { %254 = vmatpush.msra.mxu1 %v191_v21  ;;  %480 = vmatpush.msra.mxu3 %v191_v21 }
  0x14   :  { %255 = vmatpush.msra.mxu1 %v190_v22  ;;  %481 = vmatpush.msra.mxu3 %v190_v22 }
  0x16   :  { %256 = vmatpush.msra.mxu1 %v189_v23  ;;  %482 = vmatpush.msra.mxu3 %v189_v23 }
  0x18   :  { %257 = vmatpush.msra.mxu1 %v188_v25  ;;  %483 = vmatpush.msra.mxu3 %v188_v25 }
  0x19   :  { %433 = vmatmul.msk.f32.gmra.mxu2 %vm55_vm0, %v38_v10  ;;  %423 = vmatmul.msk.f32.gmra.mxu0 %vm55_vm0, %v28_v11 }
  0x1a   :  { %258 = vmatpush.msra.mxu1 %v187_v29  ;;  %484 = vmatpush.msra.mxu3 %v187_v29  ;;  %v491_v29 = vld [vmem:[%s727_s4] ss:$0 sm:$0xff] }
  0x1c   :  { %259 = vmatpush.msra.mxu1 %v186_v30  ;;  %485 = vmatpush.msra.mxu3 %v186_v30 }
  0x1e   :  { %260 = vmatpush.msra.mxu1 %v185_v31  ;;  %486 = vmatpush.msra.mxu3 %v185_v31 }
  0x21   :  { %434 = vmatmul.msk.f32.gmra.mxu2 %vm55_vm0, %v39_v12  ;;  %424 = vmatmul.msk.f32.gmra.mxu0 %vm55_vm0, %v29_v13 }
  0x29   :  { %435 = vmatmul.msk.f32.gmra.mxu2 %vm55_vm0, %v40_v14  ;;  %425 = vmatmul.msk.f32.gmra.mxu0 %vm55_vm0, %v30_v15 }
  0x31   :  { %436 = vmatmul.msk.f32.gmra.mxu2 %vm55_vm0, %v41_v16  ;;  %426 = vmatmul.msk.f32.gmra.mxu0 %vm55_vm0, %v31_v17 }
  0x39   :  { %437 = vmatmul.msk.f32.gmra.mxu2 %vm55_vm0, %v42_v18  ;;  %427 = vmatmul.msk.f32.gmra.mxu0 %vm55_vm0, %v32_v19 }
  0x41   :  { %428 = vmatmul.msk.f32.gmra.mxu0 %vm55_vm0, %v33_v24 }
  0x49   :  { %429 = vmatmul.msk.f32.gmra.mxu0 %vm55_vm0, %v34_v26 }
  0x51   :  { %430 = vmatmul.msk.f32.gmra.mxu0 %vm55_vm0, %v35_v27 }
  0x59   :  { %431 = vmatmul.msk.f32.gmra.mxu0 %vm55_vm0, %v36_v28 }
  0x8e   :  { %v121_v33 = vpop.f32.mrf.mxu0 }
  0x8f   :  { %v122_v34 = vadd.f32 %v490_v32, %v121_v33 }
  0x91   :  { %v169_v35 = vmax.f32 %v122_v34, 0.0 }
  0x93   :  { %438 = vmatmul.msk.f32.vlgmr.msra.gmra.mxu1 %vm55_vm0, %v169_v35 }
  0x94   :  { %v151_v36 = vpop.f32.mrf.mxu2 }
  0x95   :  { %v152_v37 = vadd.f32 %v490_v32, %v151_v36 }
  0x96   :  { %v124_v38 = vpop.f32.mrf.mxu0 }
  0x97   :  { %v179_v39 = vmax.f32 %v152_v37, 0.0  ;;  %v125_v40 = vadd.f32 %v490_v32, %v124_v38 }
  0x99   :  { %448 = vmatmul.msk.f32.vlgmr.msra.gmra.mxu3 %vm55_vm0, %v179_v39  ;;  %v170_v41 = vmax.f32 %v125_v40, 0.0 }
  0x9b   :  { %439 = vmatmul.msk.f32.gmra.mxu1 %vm55_vm0, %v170_v41 }
  0x9c   :  { %v154_v42 = vpop.f32.mrf.mxu2 }
  0x9d   :  { %v155_v43 = vadd.f32 %v490_v32, %v154_v42 }
  0x9e   :  { %v127_v44 = vpop.f32.mrf.mxu0 }
  0x9f   :  { %v180_v45 = vmax.f32 %v155_v43, 0.0  ;;  %v128_v46 = vadd.f32 %v490_v32, %v127_v44 }
  0xa1   :  { %449 = vmatmul.msk.f32.gmra.mxu3 %vm55_vm0, %v180_v45  ;;  %v171_v47 = vmax.f32 %v128_v46, 0.0 }
  0xa3   :  { %440 = vmatmul.msk.f32.gmra.mxu1 %vm55_vm0, %v171_v47 }
  0xa4   :  { %v157_v48 = vpop.f32.mrf.mxu2 }
  0xa5   :  { %v158_v49 = vadd.f32 %v490_v32, %v157_v48 }
  0xa6   :  { %v130_v50 = vpop.f32.mrf.mxu0 }
  0xa7   :  { %v181_v51 = vmax.f32 %v158_v49, 0.0  ;;  %v131_v52 = vadd.f32 %v490_v32, %v130_v50 }
  0xa9   :  { %450 = vmatmul.msk.f32.gmra.mxu3 %vm55_vm0, %v181_v51  ;;  %v172_v53 = vmax.f32 %v131_v52, 0.0 }
  0xab   :  { %441 = vmatmul.msk.f32.gmra.mxu1 %vm55_vm0, %v172_v53  ;;  %v327_v53 = vld [vmem:[%s729_s6] sm:$0x3] }
  0xac   :  { %v160_v54 = vpop.f32.mrf.mxu2 }
  0xad   :  { %v161_v55 = vadd.f32 %v490_v32, %v160_v54  ;;  %v518_v54 = vmov 0  }
  0xae   :  { %v133_v56 = vpop.f32.mrf.mxu0  ;;  %489 = vset.pattern.permute.xlu0 %v518_v54 }
  0xaf   :  { %v182_v57 = vmax.f32 %v161_v55, 0.0  ;;  %v134_v58 = vadd.f32 %v490_v32, %v133_v56  ;;  %330 = vperm.xlu0 %489, %v327_v53  }
  0xb1   :  { %451 = vmatmul.msk.f32.gmra.mxu3 %vm55_vm0, %v182_v57  ;;  %v173_v59 = vmax.f32 %v134_v58, 0.0 }
  0xb3   :  { %442 = vmatmul.msk.f32.gmra.mxu1 %vm55_vm0, %v173_v59 }
  0xb4   :  { %v163_v60 = vpop.f32.mrf.mxu2 }
  0xb5   :  { %v164_v61 = vadd.f32 %v490_v32, %v163_v60 }
  0xb6   :  { %v136_v62 = vpop.f32.mrf.mxu0 }
  0xb7   :  { %v183_v63 = vmax.f32 %v164_v61, 0.0  ;;  %v137_v0 = vadd.f32 %v490_v32, %v136_v62 }
  0xb9   :  { %452 = vmatmul.msk.f32.gmra.mxu3 %vm55_vm0, %v183_v63  ;;  %v174_v1 = vmax.f32 %v137_v0, 0.0 }
  0xbb   :  { %443 = vmatmul.msk.f32.gmra.mxu1 %vm55_vm0, %v174_v1 }
  0xbc   :  { %v166_v2 = vpop.f32.mrf.mxu2 }
  0xbd   :  { %v167_v3 = vadd.f32 %v490_v32, %v166_v2 }
  0xbe   :  { %v139_v4 = vpop.f32.mrf.mxu0 }
  0xbf   :  { %v184_v5 = vmax.f32 %v167_v3, 0.0  ;;  %v140_v6 = vadd.f32 %v490_v32, %v139_v4  ;;  %v326_v4 = vld [vmem:[%s728_s5] sm:$0x3] }
  0xc1   :  { %453 = vmatmul.msk.f32.gmra.mxu3 %vm55_vm0, %v184_v5  ;;  %v175_v7 = vmax.f32 %v140_v6, 0.0 }
  0xc3   :  { %444 = vmatmul.msk.f32.gmra.mxu1 %vm55_vm0, %v175_v7 }
  0xc6   :  { %v142_v8 = vpop.f32.mrf.mxu0 }
  0xc7   :  { %v143_v9 = vadd.f32 %v490_v32, %v142_v8 }
  0xc9   :  { %v176_v10 = vmax.f32 %v143_v9, 0.0 }
  0xcb   :  { %445 = vmatmul.msk.f32.gmra.mxu1 %vm55_vm0, %v176_v10 }
  0xce   :  { %v145_v11 = vpop.f32.mrf.mxu0 }
  0xcf   :  { %v146_v12 = vadd.f32 %v490_v32, %v145_v11 }
  0xd1   :  { %v177_v13 = vmax.f32 %v146_v12, 0.0 }
  0xd3   :  { %446 = vmatmul.msk.f32.gmra.mxu1 %vm55_vm0, %v177_v13 }
  0xd6   :  { %v148_v14 = vpop.f32.mrf.mxu0 }
  0xd7   :  { %v149_v15 = vadd.f32 %v490_v32, %v148_v14 }
  0xd9   :  { %v178_v16 = vmax.f32 %v149_v15, 0.0 }
  0xdb   :  { %447 = vmatmul.msk.f32.gmra.mxu1 %vm55_vm0, %v178_v16 }
 0x110   :  { %v691_v17 = vpop.f32.mrf.mxu1 }
 0x111   :  { %v263_v1 = vadd.f32 %v491_v29, %v691_v17 }
 0x113   :  { %v310_v3 = vmax.f32 %v263_v1, 0.0 }
 0x118   :  { %v265_v18 = vpop.f32.mrf.mxu1 }
 0x119   :  { %v266_v63 = vadd.f32 %v491_v29, %v265_v18 }
 0x11b   :  { %v311_v2 = vmax.f32 %v266_v63, 0.0 }
 0x11c   :  { %v292_v19 = vpop.f32.mrf.mxu3 }
 0x11d   :  { %v293_v42 = vadd.f32 %v491_v29, %v292_v19 }
 0x11f   :  { %v320_v46 = vmax.f32 %v293_v42, 0.0 }
 0x120   :  { %v268_v20 = vpop.f32.mrf.mxu1 }
 0x121   :  { %v269_v61 = vadd.f32 %v491_v29, %v268_v20  ;;  %v331_v5 = vpop.permute.xlu0 %330 }
 0x123   :  { %v312_v0 = vmax.f32 %v269_v61, 0.0 }
 0x124   :  { %v295_v21 = vpop.f32.mrf.mxu3 }
 0x125   :  { %v296_v40 = vadd.f32 %v491_v29, %v295_v21 }
 0x127   :  { %v321_v43 = vmax.f32 %v296_v40, 0.0 }
 0x128   :  { %v271_v22 = vpop.f32.mrf.mxu1 }
 0x129   :  { %v272_v59 = vadd.f32 %v491_v29, %v271_v22 }
 0x12b   :  { %v313_v62 = vmax.f32 %v272_v59, 0.0 }
 0x12c   :  { %v298_v23 = vpop.f32.mrf.mxu3 }
 0x12d   :  { %v299_v37 = vadd.f32 %v491_v29, %v298_v23 }
 0x12f   :  { %v322_v41 = vmax.f32 %v299_v37, 0.0 }
 0x130   :  { %v274_v24 = vpop.f32.mrf.mxu1 }
 0x131   :  { %v275_v57 = vadd.f32 %v491_v29, %v274_v24 }
 0x133   :  { %v314_v60 = vmax.f32 %v275_v57, 0.0 }
 0x134   :  { %v301_v25 = vpop.f32.mrf.mxu3 }
 0x135   :  { %v302_v35 = vadd.f32 %v491_v29, %v301_v25 }
 0x137   :  { %v323_v38 = vmax.f32 %v302_v35, 0.0 }
 0x138   :  { %v277_v26 = vpop.f32.mrf.mxu1 }
 0x139   :  { %v278_v55 = vadd.f32 %v491_v29, %v277_v26 }
 0x13b   :  { %v315_v58 = vmax.f32 %v278_v55, 0.0 }
 0x13c   :  { %v304_v27 = vpop.f32.mrf.mxu3 }
 0x13d   :  { %v305_v32 = vadd.f32 %v491_v29, %v304_v27 }
 0x13f   :  { %v324_v36 = vmax.f32 %v305_v32, 0.0 }
 0x140   :  { %v280_v28 = vpop.f32.mrf.mxu1 }
 0x141   :  { %v281_v51 = vadd.f32 %v491_v29, %v280_v28 }
 0x143   :  { %v316_v56 = vmax.f32 %v281_v51, 0.0 }
 0x144   :  { %v307_v30 = vpop.f32.mrf.mxu3 }
 0x145   :  { %v308_v31 = vadd.f32 %v491_v29, %v307_v30 }
 0x147   :  { %v325_v33 = vmax.f32 %v308_v31, 0.0 }
 0x148   :  { %v283_v34 = vpop.f32.mrf.mxu1 }
 0x149   :  { %454 = vmatpush.xpose.msk.msrb.mxu2 %vm55_vm0, %v325_v33  ;;  %v284_v49 = vadd.f32 %v491_v29, %v283_v34 }
 0x14b   :  { %v317_v52 = vmax.f32 %v284_v49, 0.0 }
 0x14d   :  { %455 = vmatpush.xpose.msk.msrb.mxu2 %vm55_vm0, %v324_v36 }
 0x150   :  { %v286_v39 = vpop.f32.mrf.mxu1 }
 0x151   :  { %456 = vmatpush.xpose.msk.msrb.mxu2 %vm55_vm0, %v323_v38  ;;  %v287_v48 = vadd.f32 %v491_v29, %v286_v39 }
 0x153   :  { %v318_v50 = vmax.f32 %v287_v48, 0.0 }
 0x155   :  { %457 = vmatpush.xpose.msk.msrb.mxu2 %vm55_vm0, %v322_v41 }
 0x158   :  { %v289_v44 = vpop.f32.mrf.mxu1 }
 0x159   :  { %458 = vmatpush.xpose.msk.msrb.mxu2 %vm55_vm0, %v321_v43  ;;  %v290_v45 = vadd.f32 %v491_v29, %v289_v44 }
 0x15b   :  { %v319_v47 = vmax.f32 %v290_v45, 0.0 }
 0x15d   :  { %459 = vmatpush.xpose.msk.msrb.mxu2 %vm55_vm0, %v320_v46 }
 0x161   :  { %460 = vmatpush.xpose.msk.msrb.mxu2 %vm55_vm0, %v319_v47 }
 0x165   :  { %461 = vmatpush.xpose.msk.msrb.mxu2 %vm55_vm0, %v318_v50 }
 0x169   :  { %462 = vmatpush.xpose.msk.msrb.mxu2 %vm55_vm0, %v317_v52 }
 0x16d   :  { %463 = vmatpush.xpose.msk.msrb.mxu2 %vm55_vm0, %v316_v56 }
 0x171   :  { %464 = vmatpush.xpose.msk.msrb.mxu2 %vm55_vm0, %v315_v58 }
 0x175   :  { %465 = vmatpush.xpose.msk.msrb.mxu2 %vm55_vm0, %v314_v60 }
 0x179   :  { %466 = vmatpush.xpose.msk.msrb.mxu2 %vm55_vm0, %v313_v62 }
 0x17d   :  { %467 = vmatpush.xpose.msk.msrb.mxu2 %vm55_vm0, %v312_v0 }
 0x181   :  { %468 = vmatpush.xpose.msk.msrb.mxu2 %vm55_vm0, %v311_v2 }
 0x185   :  { %469 = vmatpush.xpose.msk.msrb.mxu2 %vm55_vm0, %v310_v3 }
 0x188   :  { %470 = vmatmul.msk.f32.vlgmr.msrb.gmra.mxu2 %vm55_vm0, %v326_v4 }
 0x20b   :  { %v401_v6 = vpop.f32.mrf.mxu2 }
 0x20c   :  { %v402_v7 = vadd.f32 %v401_v6, %v331_v5 }
 0x20e   :  { %v404_v8 = vmax.f32 %v402_v7, 0.0 }
 0x210   :  { %405 = vst [vmem:[#allocation2] sm:$0x3] %v404_v8 }
 0x211   :  { %416 = dma.vmem_to_hbm [thread:$0]  %s412_s21, 32, %s414_s23, [#allocation3]  }
 0x212   :  { %516 = dma.done.wait [#allocation3], 32  }
 0x213   :  { %517 = vsyncadd [#allocation3], 4294967264 }
 0x214   :  { %421 = vsyncpa [#allocation3], 1 }

</bundles_post_ra>
